<compile_context>
chip_gen: v7x
topology: tpu7x:2x2x1
jax: 0.10.0
libtpu: 0.0.40
codegen_flags: <defaults>
</compile_context>

<pallas_src>
import functools

import jax
import jax.numpy as jnp
from jax.experimental import pallas as pl
from jax.experimental.pallas import tpu as pltpu


_DEFAULT_BLOCK_B = 256    # rows per tile (sublanes);   sweep up on v5e/v6e
_DEFAULT_BLOCK_C = 8192   # classes per tile (lanes);   multiple of 128


# ----------------------------------------------------------------------------
# Fused kernel: online log-softmax + label smoothing + per-sample NLL
# ----------------------------------------------------------------------------
def _lsce_kernel(x_ref, t_ref, loss_ref, m_ref, l_ref, ws_ref, *,
                 e, num_classes, n_valid_rows, block_b, block_c,
                 ragged_b, ragged_c):
    i = pl.program_id(0)                       # batch tile   ("parallel")
    j = pl.program_id(1)                       # class tile   ("arbitrary"/reduction)
    n_ctiles = pl.num_programs(1)

    # Reset the per-row carries at the start of every batch tile.
    @pl.when(j == 0)
    def _():
        m_ref[...] = jnp.full(m_ref.shape, -jnp.inf, jnp.float32)
        l_ref[...] = jnp.zeros(l_ref.shape, jnp.float32)
        ws_ref[...] = jnp.zeros(ws_ref.shape, jnp.float32)

    x = x_ref[...].astype(jnp.float32)         # (bt, ct), classes on lanes
    t = t_ref[...]                             # (bt, 1) int32 labels
    bt, ct = x.shape

    # Smoothing weights for this class tile.  Over the FULL class dimension the
    # weights sum to exactly 1, so  loss = logsumexp(x) - sum_c w_c * x_c.
    col = jax.lax.broadcasted_iota(jnp.int32, (bt, ct), 1) + j * block_c
    w = jnp.where(col == t, e / num_classes + (1.0 - e), e / num_classes)

    x_lse = x
    x_ws = x
    if ragged_c:  # static: only emitted when C % block_c != 0 (ragged last tile)
        valid_c = col < num_classes
        w = jnp.where(valid_c, w, 0.0)
        x_lse = jnp.where(valid_c, x, -jnp.inf)   # ignored by logsumexp
        x_ws = jnp.where(valid_c, x, 0.0)         # avoid 0 * garbage = NaN

    # Online logsumexp carry (f32 accumulation; required on v5e).
    m_prev = m_ref[...]
    m_new = jnp.maximum(m_prev, jnp.max(x_lse, axis=1, keepdims=True))
    l_ref[...] = (l_ref[...] * jnp.exp(m_prev - m_new)
                  + jnp.sum(jnp.exp(x_lse - m_new), axis=1, keepdims=True))
    m_ref[...] = m_new

    # Single fused cross-lane reduce for the smoothed NLL numerator.
    ws_ref[...] = ws_ref[...] + jnp.sum(w * x_ws, axis=1, keepdims=True)

    # Finalize once per batch tile (output block index depends only on i, so the
    # HBM writeback also happens once per batch tile).
    @pl.when(j == n_ctiles - 1)
    def _():
        loss = m_ref[...] + jnp.log(l_ref[...]) - ws_ref[...]     # (bt, 1)
        if ragged_b:  # static: only emitted when B % block_b != 0
            row = jax.lax.broadcasted_iota(jnp.int32, (bt, 1), 0) + i * block_b
            loss = jnp.where(row < n_valid_rows, loss, 0.0)
        loss_ref[...] = loss


# ----------------------------------------------------------------------------
# Wrapper (keeps the PyTorch forward semantics: validation + reduction modes)
# ----------------------------------------------------------------------------
def label_smooth_cross_entropy(x, target, *, e=0.1, reduction="mean",
                               block_b=None, block_c=None,
                               vmem_limit_bytes=64 * 1024 * 1024):
    """x: (B, C) logits (native dtype is streamed, no upcast); target: (B,) ints."""
    x = jnp.asarray(x)                           # keep native dtype (bf16/f16/f32)
    target = jnp.asarray(target, jnp.int32)

    if x.ndim < 2:
        raise ValueError(
            "Expected input tensor to have least 2 dimensions(got {})".format(x.shape))
    if x.ndim != 2:
        raise ValueError(
            "Only 2 dimension tensor are implemented, (got {})".format(x.shape))
    if x.shape[0] != target.shape[0]:
        raise ValueError(
            "Expected input batchsize ({}) to match target batch_size({})".format(
                x.shape[0], target.shape[0]))
    if reduction not in ("none", "sum", "mean"):
        raise ValueError(
            "unrecognized option, expect reduction to be one of none, mean, sum")

    B, C = x.shape

    # Tile sizes: last two block dims must be multiples of (8, 128) or full-extent.
    bb = _DEFAULT_BLOCK_B if block_b is None else int(block_b)
    bb = min(bb, B)
    if bb < B:
        bb = max(8, (bb // 8) * 8)
    bc = _DEFAULT_BLOCK_C if block_c is None else int(block_c)
    bc = min(bc, C)
    if bc < C:
        bc = max(128, (bc // 128) * 128)

    n_btiles = pl.cdiv(B, bb)
    n_ctiles = pl.cdiv(C, bc)
    ragged_b = (B % bb) != 0
    ragged_c = (C % bc) != 0

    kernel = functools.partial(
        _lsce_kernel, e=float(e), num_classes=C, n_valid_rows=B,
        block_b=bb, block_c=bc, ragged_b=ragged_b, ragged_c=ragged_c)

    loss_col = pl.pallas_call(
        kernel,
        out_shape=jax.ShapeDtypeStruct((B, 1), jnp.float32),
        grid=(n_btiles, n_ctiles),
        in_specs=[
            # Logits stream through VMEM in their native dtype, class-tiled.
            pl.BlockSpec((bb, bc), lambda i, j: (i, j)),
            # Targets: block index depends only on i -> DMA'd once per batch tile.
            pl.BlockSpec((bb, 1), lambda i, j: (i, 0)),
        ],
        out_specs=pl.BlockSpec((bb, 1), lambda i, j: (i, 0)),
        scratch_shapes=[
            pltpu.VMEM((bb, 1), jnp.float32),    # running max
            pltpu.VMEM((bb, 1), jnp.float32),    # running sum(exp(x - max))
            pltpu.VMEM((bb, 1), jnp.float32),    # running sum(w * x)
        ],
        compiler_params=pltpu.CompilerParams(
            # Batch tiles are independent -> shardable across TensorCores (v7x);
            # the class axis carries the online-logsumexp reduction.
            dimension_semantics=("parallel", "arbitrary"),
            vmem_limit_bytes=vmem_limit_bytes),
    )(x, target.reshape(B, 1))

    loss = loss_col[:, 0]
    if reduction == "none":
        return loss
    total = jnp.sum(loss)            # tiny B-element reduction in the wrapper
    if reduction == "sum":
        return total
    return total / B                 # mean


# ----------------------------------------------------------------------------
# Pure-JAX reference with identical math (correctness check)
# ----------------------------------------------------------------------------
def _reference(x, target, *, e=0.1, reduction="mean"):
    x32 = jnp.asarray(x, jnp.float32)
    B, C = x32.shape
    logp = jax.nn.log_softmax(x32, axis=1)
    smoothed = jax.nn.one_hot(target, C, dtype=jnp.float32) * (1.0 - e) + e / C
    loss = jnp.sum(-logp * smoothed, axis=1)
    if reduction == "none":
        return loss
    if reduction == "sum":
        return jnp.sum(loss)
    return jnp.mean(loss)


if __name__ == "__main__":
    key = jax.random.PRNGKey(0)
    kx, kt, kx2, kt2 = jax.random.split(key, 4)

    # --- small canonical shapes (single tile) ------------------------------
    B, C = 8, 32
    x = jax.random.normal(kx, (B, C), jnp.float32)
    target = jax.random.randint(kt, (B,), 0, C)

    for red in ("mean", "sum", "none"):
        out = jax.block_until_ready(
            label_smooth_cross_entropy(x, target, e=0.1, reduction=red))
        ref = _reference(x, target, e=0.1, reduction=red)
        assert bool(jnp.allclose(out, ref, atol=1e-5, rtol=1e-5)), (red, out, ref)

    # --- bf16 streaming + batch/class tiling + ragged edge masks -----------
    # (exercises the online logsumexp across class tiles and both ragged paths)
    B2, C2 = 36, 200
    x2 = (jax.random.normal(kx2, (B2, C2), jnp.float32) * 3.0).astype(jnp.bfloat16)
    t2 = jax.random.randint(kt2, (B2,), 0, C2)
    out2 = jax.block_until_ready(
        label_smooth_cross_entropy(x2, t2, e=0.1, reduction="mean",
                                   block_b=16, block_c=128))
    ref2 = _reference(x2, t2, e=0.1, reduction="mean")
    assert bool(jnp.allclose(out2, ref2, atol=1e-3, rtol=1e-3)), (out2, ref2)

    out2n = jax.block_until_ready(
        label_smooth_cross_entropy(x2, t2, e=0.1, reduction="none",
                                   block_b=16, block_c=128))
    ref2n = _reference(x2, t2, e=0.1, reduction="none")
    assert bool(jnp.allclose(out2n, ref2n, atol=1e-3, rtol=1e-3))

    print("KERNEL_OK")
</pallas_src>

<mosaic_0001>
module attributes {stable_mosaic.version = 11 : i64} {
  func.func @_lsce_kernel(%arg0: i32, %arg1: i32, %arg2: memref<8x32xf32, #tpu.memory_space<vmem>>, %arg3: memref<8x1xi32, #tpu.memory_space<vmem>>, %arg4: memref<8x1xf32, #tpu.memory_space<vmem>>, %arg5: memref<8x1xf32, #tpu.memory_space<vmem>>, %arg6: memref<8x1xf32, #tpu.memory_space<vmem>>, %arg7: memref<8x1xf32, #tpu.memory_space<vmem>>) attributes {dimension_semantics = [#tpu.dimension_semantics<parallel>, #tpu.dimension_semantics<arbitrary>], iteration_bounds = array<i64: 1, 1>, scalar_prefetch = 0 : i64, scratch_operands = 3 : i64, tpu.core_type = #tpu.core_type<tc>, window_params = [{transform_indices = @transform_0, window_bounds = array<i64: 8, 32>}, {transform_indices = @transform_1, window_bounds = array<i64: 8, 1>}, {transform_indices = @transform_2, window_bounds = array<i64: 8, 1>}]} {
    %c0_i32 = arith.constant 0 : i32
    %0 = arith.cmpi eq, %arg1, %c0_i32 : i32
    %1 = arith.extui %0 : i1 to i32
    %c0_i32_0 = arith.constant 0 : i32
    %2 = arith.cmpi ne, %1, %c0_i32_0 : i32
    scf.if %2 {
      %cst_22 = arith.constant 0xFF800000 : f32
      %39 = vector.broadcast %cst_22 : f32 to vector<8x1xf32>
      %c0_23 = arith.constant 0 : index
      %c0_24 = arith.constant 0 : index
      %40 = vector.load %arg5[%c0_23, %c0_24] : memref<8x1xf32, #tpu.memory_space<vmem>>, vector<8x1xf32>
      tpu.vector_store %arg5[%c0_23, %c0_24], %39 {strides = array<i32>} : memref<8x1xf32, #tpu.memory_space<vmem>>, vector<8x1xf32>,
      %cst_25 = arith.constant 0.000000e+00 : f32
      %41 = vector.broadcast %cst_25 : f32 to vector<8x1xf32>
      %c0_26 = arith.constant 0 : index
      %c0_27 = arith.constant 0 : index
      %42 = vector.load %arg6[%c0_26, %c0_27] : memref<8x1xf32, #tpu.memory_space<vmem>>, vector<8x1xf32>
      tpu.vector_store %arg6[%c0_26, %c0_27], %41 {strides = array<i32>} : memref<8x1xf32, #tpu.memory_space<vmem>>, vector<8x1xf32>,
      %cst_28 = arith.constant 0.000000e+00 : f32
      %43 = vector.broadcast %cst_28 : f32 to vector<8x1xf32>
      %c0_29 = arith.constant 0 : index
      %c0_30 = arith.constant 0 : index
      %44 = vector.load %arg7[%c0_29, %c0_30] : memref<8x1xf32, #tpu.memory_space<vmem>>, vector<8x1xf32>
      tpu.vector_store %arg7[%c0_29, %c0_30], %43 {strides = array<i32>} : memref<8x1xf32, #tpu.memory_space<vmem>>, vector<8x1xf32>,
    } else {
    }
    %c0 = arith.constant 0 : index
    %c0_1 = arith.constant 0 : index
    %3 = vector.load %arg2[%c0, %c0_1] : memref<8x32xf32, #tpu.memory_space<vmem>>, vector<8x32xf32>
    %c0_2 = arith.constant 0 : index
    %c0_3 = arith.constant 0 : index
    %4 = vector.load %arg3[%c0_2, %c0_3] : memref<8x1xi32, #tpu.memory_space<vmem>>, vector<8x1xi32>
    %5 = tpu.iota {dimensions = array<i32: 1>} : vector<8x32xi32>
    %c32_i32 = arith.constant 32 : i32
    %6 = arith.muli %arg1, %c32_i32 : i32
    %7 = vector.broadcast %6 : i32 to vector<8x32xi32>
    %8 = arith.addi %5, %7 : vector<8x32xi32>
    %9 = vector.broadcast %4 : vector<8x1xi32> to vector<8x32xi32>
    %10 = arith.cmpi eq, %8, %9 : vector<8x32xi32>
    %cst = arith.constant 0.903124988 : f32
    %cst_4 = arith.constant 3.125000e-03 : f32
    %11 = vector.broadcast %cst : f32 to vector<8x32xf32>
    %12 = vector.broadcast %cst_4 : f32 to vector<8x32xf32>
    %13 = arith.select %10, %11, %12 : vector<8x32xi1>, vector<8x32xf32>
    %c0_5 = arith.constant 0 : index
    %c0_6 = arith.constant 0 : index
    %14 = vector.load %arg5[%c0_5, %c0_6] : memref<8x1xf32, #tpu.memory_space<vmem>>, vector<8x1xf32>
    %cst_7 = arith.constant dense<0xFF800000> : vector<8xf32>
    %15 = vector.multi_reduction <maximumf>, %3, %cst_7 [1] : vector<8x32xf32> to vector<8xf32>
    %16 = vector.shape_cast %15 : vector<8xf32> to vector<8x1xf32>
    %17 = arith.maximumf %14, %16 : vector<8x1xf32>
    %c0_8 = arith.constant 0 : index
    %c0_9 = arith.constant 0 : index
    %18 = vector.load %arg6[%c0_8, %c0_9] : memref<8x1xf32, #tpu.memory_space<vmem>>, vector<8x1xf32>
    %19 = arith.subf %14, %17 : vector<8x1xf32>
    %20 = math.exp %19 : vector<8x1xf32>
    %21 = arith.mulf %18, %20 : vector<8x1xf32>
    %22 = vector.broadcast %17 : vector<8x1xf32> to vector<8x32xf32>
    %23 = arith.subf %3, %22 : vector<8x32xf32>
    %24 = math.exp %23 : vector<8x32xf32>
    %cst_10 = arith.constant dense<0.000000e+00> : vector<8xf32>
    %25 = vector.multi_reduction <add>, %24, %cst_10 [1] : vector<8x32xf32> to vector<8xf32>
    %26 = vector.shape_cast %25 : vector<8xf32> to vector<8x1xf32>
    %27 = arith.addf %21, %26 : vector<8x1xf32>
    %c0_11 = arith.constant 0 : index
    %c0_12 = arith.constant 0 : index
    %28 = vector.load %arg6[%c0_11, %c0_12] : memref<8x1xf32, #tpu.memory_space<vmem>>, vector<8x1xf32>
    tpu.vector_store %arg6[%c0_11, %c0_12], %27 {strides = array<i32>} : memref<8x1xf32, #tpu.memory_space<vmem>>, vector<8x1xf32>,
    %c0_13 = arith.constant 0 : index
    %c0_14 = arith.constant 0 : index
    %29 = vector.load %arg5[%c0_13, %c0_14] : memref<8x1xf32, #tpu.memory_space<vmem>>, vector<8x1xf32>
    tpu.vector_store %arg5[%c0_13, %c0_14], %17 {strides = array<i32>} : memref<8x1xf32, #tpu.memory_space<vmem>>, vector<8x1xf32>,
    %c0_15 = arith.constant 0 : index
    %c0_16 = arith.constant 0 : index
    %30 = vector.load %arg7[%c0_15, %c0_16] : memref<8x1xf32, #tpu.memory_space<vmem>>, vector<8x1xf32>
    %31 = arith.mulf %13, %3 : vector<8x32xf32>
    %cst_17 = arith.constant dense<0.000000e+00> : vector<8xf32>
    %32 = vector.multi_reduction <add>, %31, %cst_17 [1] : vector<8x32xf32> to vector<8xf32>
    %33 = vector.shape_cast %32 : vector<8xf32> to vector<8x1xf32>
    %34 = arith.addf %30, %33 : vector<8x1xf32>
    %c0_18 = arith.constant 0 : index
    %c0_19 = arith.constant 0 : index
    %35 = vector.load %arg7[%c0_18, %c0_19] : memref<8x1xf32, #tpu.memory_space<vmem>>, vector<8x1xf32>
    tpu.vector_store %arg7[%c0_18, %c0_19], %34 {strides = array<i32>} : memref<8x1xf32, #tpu.memory_space<vmem>>, vector<8x1xf32>,
    %c0_i32_20 = arith.constant 0 : i32
    %36 = arith.cmpi eq, %arg1, %c0_i32_20 : i32
    %37 = arith.extui %36 : i1 to i32
    %c0_i32_21 = arith.constant 0 : i32
    %38 = arith.cmpi ne, %37, %c0_i32_21 : i32
    scf.if %38 {
      %c0_22 = arith.constant 0 : index
      %c0_23 = arith.constant 0 : index
      %39 = vector.load %arg5[%c0_22, %c0_23] : memref<8x1xf32, #tpu.memory_space<vmem>>, vector<8x1xf32>
      %c0_24 = arith.constant 0 : index
      %c0_25 = arith.constant 0 : index
      %40 = vector.load %arg6[%c0_24, %c0_25] : memref<8x1xf32, #tpu.memory_space<vmem>>, vector<8x1xf32>
      %41 = math.log %40 : vector<8x1xf32>
      %42 = arith.addf %39, %41 : vector<8x1xf32>
      %c0_26 = arith.constant 0 : index
      %c0_27 = arith.constant 0 : index
      %43 = vector.load %arg7[%c0_26, %c0_27] : memref<8x1xf32, #tpu.memory_space<vmem>>, vector<8x1xf32>
      %44 = arith.subf %42, %43 : vector<8x1xf32>
      %c0_28 = arith.constant 0 : index
      %c0_29 = arith.constant 0 : index
      %45 = vector.load %arg4[%c0_28, %c0_29] : memref<8x1xf32, #tpu.memory_space<vmem>>, vector<8x1xf32>
      tpu.vector_store %arg4[%c0_28, %c0_29], %44 {strides = array<i32>} : memref<8x1xf32, #tpu.memory_space<vmem>>, vector<8x1xf32>,
    } else {
    }
    return
  }
  func.func @transform_0(%arg0: i32, %arg1: i32) -> (i32, i32) {
    %c0_i32 = arith.constant 0 : i32
    return %arg0, %arg1 : i32, i32
  }
  func.func @transform_1(%arg0: i32, %arg1: i32) -> (i32, i32) {
    %c0_i32 = arith.constant 0 : i32
    %c0_i32_0 = arith.constant 0 : i32
    return %arg0, %c0_i32 : i32, i32
  }
  func.func @transform_2(%arg0: i32, %arg1: i32) -> (i32, i32) {
    %c0_i32 = arith.constant 0 : i32
    %c0_i32_0 = arith.constant 0 : i32
    return %arg0, %c0_i32 : i32, i32
  }
}

</mosaic_0001>

<bundles_post_ra>
// kernel: tpu_custom_call.1
= control target key start
LH: loop header
LB: loop body
LE: loop exit
PB: predicated region body
PF: predicated region fallthrough
CT: control target
= control target key end

     0   :  { %7 = vsyncpa [#allocation6], 0  ;;  %s271_s0 = inlined_call_operand.hbm [shape: f32[8,32], index: 0, kind: input, shape index: {}]   ;;  %s272_s1 = inlined_call_operand.hbm [shape: s32[8,1], index: 1, kind: input, shape index: {}]   ;;  %s273_s2 = inlined_call_operand.hbm [shape: f32[8,1], index: 2, kind: output, shape index: {}]  }
   0x1   :  { %8 = vsyncpa [#allocation9], 0 }
   0x2   :  { %9 = vsyncpa [#allocation7], 0  ;;  %s203_s9 = smov [#allocation5]   ;;  %s204_s11 = smov [#allocation8]  }
   0x3   :  { %s16_s10 = sshll.u32 %s203_s9, 4  ;;  %s26_s12 = sshll.u32 %s204_s11, 4  ;;  %s17_s10 = int_to_ptr.vmem [resolvable:$true] %s16_s10  ;;  %s27_s12 = int_to_ptr.vmem [resolvable:$true] %s26_s12 }
   0x4   :  { %s131_s15 = scalar_lea.hbm %s271_s0, 128 }
   0x5   :  { %p132_p0 = scmp.ne.s32.totalorder %s271_s0, %s131_s15  ;;  %p135_p1 = scmp.lt.u32.totalorder %s131_s15, %s271_s0 }
   0x7   :  { %p137_p2 = pnand %p135_p1, %p132_p0 }
   0x9   :  { %140 = shalt.err (!%p137_p2)
}
   0xa   :  { %s141_s20 = scalar_lea.vmem %s17_s10, 128  ;;  %p146_p4 = scmp.lt.s32.totalorder %s17_s10, %s17_s10 }
   0xb   :  { %p142_p3 = scmp.ne.s32.totalorder %s17_s10, %s141_s20  ;;  %p147_p5 = scmp.lt.s32.totalorder %s141_s20, %s141_s20 }
   0xd   :  { %p148_p6 = por %p147_p5, %p146_p4 }
   0xf   :  { %p149_p7 = pnand %p148_p6, %p142_p3 }
  0x11   :  { %152 = shalt.err (!%p149_p7)
}
  0x12   :  { %19 = dma.hbm_to_vmem [thread:$0]  %s271_s0, 128, %s17_s10, [#allocation6]  }
  0x13   :  { %s153_s25 = scalar_lea.hbm %s272_s1, 128 }
  0x14   :  { %p154_p8 = scmp.ne.s32.totalorder %s272_s1, %s153_s25  ;;  %p157_p9 = scmp.lt.u32.totalorder %s153_s25, %s272_s1 }
  0x16   :  { %p159_p10 = pnand %p157_p9, %p154_p8 }
  0x18   :  { %162 = shalt.err (!%p159_p10)
}
  0x19   :  { %s163_s30 = scalar_lea.vmem %s27_s12, 128  ;;  %p168_p12 = scmp.lt.s32.totalorder %s27_s12, %s27_s12 }
  0x1a   :  { %p164_p11 = scmp.ne.s32.totalorder %s27_s12, %s163_s30  ;;  %p169_p13 = scmp.lt.s32.totalorder %s163_s30, %s163_s30 }
  0x1c   :  { %p170_p0 = por %p169_p13, %p168_p12 }
  0x1e   :  { %p171_p1 = pnand %p170_p0, %p164_p11 }
  0x20   :  { %174 = shalt.err (!%p171_p1)
}
  0x21   :  { %29 = dma.hbm_to_vmem [thread:$0]  %s272_s1, 128, %s27_s12, [#allocation9]  }
  0x22   :  { %197 = dma.done.wait [#allocation6], 128  }
  0x23   :  { %198 = vsyncadd [#allocation6], 4294967168 }
  0x24   :  { %199 = dma.done.wait [#allocation9], 128  }
  0x25   :  { %200 = vsyncadd [#allocation9], 4294967168  ;;  %vm40_vm0 = vcmask 7168   ;;  %v205_v0 = vmov -inf   ;;  %vm57_vm1 = vcmask 261120   ;;  %v44_v1 = vld [vmem:[#allocation5] sm:$0xff]  ;;  %v46_v11 = vlaneseq }
  0x26   :  { %41 = vst.msk [vmem:[#allocation2] sm:$0xff] %vm40_vm0, %v205_v0  ;;  %v58_v2 = vsel %vm57_vm1, %v44_v1, -inf  ;;  %v206_v3 = vmov 0   ;;  %v45_v4 = vld [vmem:[#allocation8] sm:$0xff]  ;;  %v207_v5 = vmov 0.0   ;;  %s209_s1 = smov [#allocation10]  }
  0x27   :  { %59 = vmax.xlane.f32.xlu0 %v58_v2  ;;  %124 = vset.pattern.permute.xlu1 %v206_v3  ;;  %42 = vst.msk [vmem:[#allocation3] sm:$0xff] %vm40_vm0, %v207_v5  ;;  %43 = vst.msk [vmem:[#allocation4] sm:$0xff] %vm40_vm0, %v207_v5  ;;  %v47_v14 = vand.u32 127, %v46_v11  ;;  %v208_v16 = vmov 0.003125   ;;  %s106_s4 = sshll.u32 %s209_s1, 4  ;;  %s107_s4 = int_to_ptr.vmem [resolvable:$true] %s106_s4 }
  0x28   :  { %123 = vset.pattern.permute.xlu0 %v206_v3  ;;  %52 = vperm.xlu1 %124, %v45_v4   ;;  %s175_s5 = scalar_lea.vmem %s107_s4, 128  ;;  %p180_p3 = scmp.lt.s32.totalorder %s107_s4, %s107_s4 }
  0x29   :  { %p176_p2 = scmp.ne.s32.totalorder %s107_s4, %s175_s5  ;;  %p181_p4 = scmp.lt.s32.totalorder %s175_s5, %s175_s5 }
  0x2b   :  { %p182_p5 = por %p181_p4, %p180_p3 }
  0x2d   :  { %v56_v6 = vld [vmem:[#allocation2] sm:$0xff]  ;;  %p183_p6 = pnand %p182_p5, %p176_p2 }
  0x2e   :  { %v62_v24 = vld [vmem:[#allocation3] sm:$0xff]  ;;  %v82_v28 = vld [vmem:[#allocation4] sm:$0xff] }
  0xa7   :  { %v53_v15 = vpop.permute.xlu1 %52 }
  0xa8   :  { %vm54_vm2 = vcmp.eq.s32.totalorder %v47_v14, %v53_v15 }
  0xa9   :  { %v55_v17 = vsel %vm54_vm2, 0.903125, %v208_v16 }
  0xaa   :  { %v83_v18 = vmul.f32 %v55_v17, %v44_v1 }
  0xac   :  { %v84_v21 = vsel %vm57_vm1, %v83_v18, 0.0 }
  0xb4   :  { %v60_v7 = vpop.xlane.xlu0 %59 }
  0xb5   :  { %v61_v8 = vmax.f32 %v56_v6, %v60_v7 }
  0xb7   :  { %v63_v9 = vsub.f32 %v56_v6, %v61_v8  ;;  %81 = vst.msk [vmem:[#allocation2] sm:$0xff] %vm40_vm0, %v61_v8  ;;  %69 = vperm.xlu0 %123, %v61_v8  }
  0xb9   :  { %v64_v22 = vmul.f32 1.442695, %v63_v9 }
  0xbe   :  { %v92_v34 = vld [vmem:[#allocation2] sm:$0xff] }
 0x136   :  { %v70_v10 = vpop.permute.xlu0 %69 }
 0x137   :  { %v72_v12 = vsub.f32 %v44_v1, %v70_v10 }
 0x139   :  { %v73_v13 = vmul.f32 1.442695, %v72_v12 }
 0x13b   :  { %125 = vpow2.f32 %v73_v13 }
 0x13c   :  { %127 = vpow2.f32 %v64_v22 }
 0x145   :  { %v126_v19 = vpop.eup %125 }
 0x146   :  { %v75_v20 = vsel %vm57_vm1, %v126_v19, 0.0  ;;  %v128_v23 = vpop.eup %127 }
 0x147   :  { %76 = vadd.xlane.f32.xlu1 %v75_v20  ;;  %v66_v25 = vmul.f32 %v128_v23, %v62_v24 }
 0x14b   :  { %85 = vadd.xlane.f32.xlu1 %v84_v21 }
 0x1d4   :  { %v77_v26 = vpop.xlane.xlu1 %76 }
 0x1d5   :  { %v78_v27 = vadd.f32 %v77_v26, %v66_v25 }
 0x1d7   :  { %80 = vst.msk [vmem:[#allocation3] sm:$0xff] %vm40_vm0, %v78_v27 }
 0x1d8   :  { %v86_v29 = vpop.xlane.xlu1 %85 }
 0x1d9   :  { %v87_v30 = vadd.f32 %v86_v29, %v82_v28 }
 0x1db   :  { %88 = vst.msk [vmem:[#allocation4] sm:$0xff] %vm40_vm0, %v87_v30 }
 0x1de   :  { %v93_v31 = vld [vmem:[#allocation3] sm:$0xff] }
 0x1df   :  { %129 = vlog2.f32 %v93_v31 }
 0x1e2   :  { %v97_v35 = vld [vmem:[#allocation4] sm:$0xff] }
 0x1e9   :  { %v130_v32 = vpop.eup %129 }
 0x1ea   :  { %v95_v33 = vmul.f32 0.6931472, %v130_v32 }
 0x1ec   :  { %v96_v36 = vadd.f32 %v95_v33, %v92_v34 }
 0x1ee   :  { %v98_v37 = vsub.f32 %v96_v36, %v97_v35 }
 0x1f0   :  { %99 = vst.msk [vmem:[#allocation10] sm:$0xff] %vm40_vm0, %v98_v37 }
 0x1f1   :  { %186 = shalt.err (!%p183_p6)
}
 0x1f2   :  { %s187_s8 = scalar_lea.hbm %s273_s2, 128 }
 0x1f3   :  { %p188_p7 = scmp.ne.s32.totalorder %s273_s2, %s187_s8  ;;  %p191_p8 = scmp.lt.u32.totalorder %s187_s8, %s273_s2 }
 0x1f5   :  { %p193_p9 = pnand %p191_p8, %p188_p7 }
 0x1f7   :  { %196 = shalt.err (!%p193_p9)
}
 0x1f8   :  { %109 = dma.vmem_to_hbm [thread:$0]  %s107_s4, 128, %s273_s2, [#allocation7]  }
 0x1f9   :  { %201 = dma.done.wait [#allocation7], 128  }
 0x1fa   :  { %202 = vsyncadd [#allocation7], 4294967168 }
 0x1fb   :  { %113 = vsyncpa [#allocation6], 1 }
 0x1fc   :  { %114 = vsyncpa [#allocation9], 1 }
 0x1fd   :  { %115 = vsyncpa [#allocation7], 1 }

</bundles_post_ra>
